<compile_context>
chip_gen: v7x
topology: tpu7x:2x2x1
jax: 0.10.0
libtpu: 0.0.40
codegen_flags: <defaults>
</compile_context>

<pallas_src>
import jax
import jax.numpy as jnp
from jax.experimental import pallas as pl
from jax.experimental.pallas import tpu as pltpu


def poly_gc_kernel(x_ref, l_ref, w_ref, b_ref, o_ref):
    # x_ref: (N, B*F)       batch-folded input, lane index = b*F + f
    # l_ref: (N, N)         dense graph Laplacian (MXU dtype)
    # w_ref: (K, F, Opad)   per-order projection weights, Opad = multiple of 128
    # b_ref: (1, Opad)      bias (f32)
    # o_ref: (B, NP, Opad)  pooled output (lane-dense)
    N = l_ref.shape[0]
    K, F, Opad = w_ref.shape
    B, NP, _ = o_ref.shape
    P = N // NP                              # pooling size (static)
    f32 = jnp.float32
    mx = l_ref.dtype                         # MXU input dtype (f32 or bf16)

    L = l_ref[...]                           # (N, N), stays in MXU dtype
    t_f32 = x_ref[...].astype(f32)           # T_0, f32 master copy
    t_mx = x_ref[...].astype(mx)             # T_0, MXU copy
    tm1_f32 = t_f32                          # placeholder; real value set at k=1

    # ---- Chebyshev recurrence fused with per-order projection accumulation ----
    #   T_0 = X, T_1 = L X, T_k = 2 L T_{k-1} - T_{k-2};  y_b += T_k[:, b] @ W_k
    ys = [None] * B                          # per-batch (N, Opad) f32 accumulators
    for k in range(K):
        if k == 1:
            nxt = jnp.dot(L, t_mx, preferred_element_type=f32)
            tm1_f32, t_f32 = t_f32, nxt
            t_mx = t_f32.astype(mx)
        elif k >= 2:
            nxt = 2.0 * jnp.dot(L, t_mx, preferred_element_type=f32) - tm1_f32
            tm1_f32, t_f32 = t_f32, nxt
            t_mx = t_f32.astype(mx)
        wk = w_ref[k]                        # (F, Opad), MXU dtype
        for b in range(B):
            c = jnp.dot(t_mx[:, b * F:(b + 1) * F], wk,
                        preferred_element_type=f32)
            ys[b] = c if k == 0 else ys[b] + c

    # ---- brelu (one bias per output channel) + max-pool over the node axis ----
    bias = b_ref[...].astype(f32)            # (1, Opad)
    for b in range(B):
        y = jnp.maximum(ys[b] + bias, 0.0)   # (N, Opad), f32
        if P > 1:
            y = jnp.max(y.reshape(NP, P, Opad), axis=1)   # value-level pool
        o_ref[b] = y.astype(o_ref.dtype)     # full-lane (NP, Opad) store


def poly_gc_forward(x, laplacian, weight, bias, pooling_size,
                    matmul_dtype=jnp.float32):
    B, N, F = x.shape
    KF, O = weight.shape
    K = KF // F
    assert K * F == KF
    assert N % pooling_size == 0
    NP = N // pooling_size
    Opad = ((O + 127) // 128) * 128          # lane-dense output channels

    # Repack the PyTorch weight layout (rows indexed f*K + k, from the
    # (B*N, F, K) flatten in `chebyshev`) into per-order (K, F, O) blocks and
    # zero-pad the output channels up to Opad lanes.
    w_korder = jnp.transpose(weight.reshape(F, K, O), (1, 0, 2))     # (K, F, O)
    w_korder = jnp.pad(w_korder, ((0, 0), (0, 0), (0, Opad - O)))
    bias_pad = jnp.pad(bias.reshape(1, O), ((0, 0), (0, Opad - O)))  # stays f32

    # Fold batch into lanes: x_folded[n, b*F + f] = x[b, n, f].
    x_folded = jnp.transpose(x, (1, 0, 2)).reshape(N, B * F)

    x_in = x_folded.astype(matmul_dtype)
    l_in = laplacian.astype(matmul_dtype)
    w_in = w_korder.astype(matmul_dtype)

    isz = jnp.dtype(matmul_dtype).itemsize
    cost = pl.CostEstimate(
        flops=2 * (K - 1) * N * N * (B * F) + 2 * B * K * N * F * Opad,
        transcendentals=0,
        bytes_accessed=(x_in.size * isz + l_in.size * isz + w_in.size * isz
                        + bias_pad.size * 4 + B * NP * Opad * 4),
    )

    vmem = pltpu.MemorySpace.VMEM
    out = pl.pallas_call(
        poly_gc_kernel,
        out_shape=jax.ShapeDtypeStruct((B, NP, Opad), jnp.float32),
        in_specs=[pl.BlockSpec(memory_space=vmem)] * 4,   # whole-array, resident
        out_specs=pl.BlockSpec(memory_space=vmem),
        cost_estimate=cost,
    )(x_in, l_in, w_in, bias_pad)
    return out[..., :O]


def poly_gc_reference(x, laplacian, weight, bias, pooling_size):
    """Plain-JAX reference mirroring the PyTorch module exactly (for validation)."""
    B, N, F = x.shape
    KF, O = weight.shape
    K = KF // F
    x0 = jnp.transpose(x, (1, 2, 0)).reshape(N, F * B)
    x_list = [x0]
    if K > 1:
        x1 = laplacian @ x0
        x_list.append(x1)
        for _ in range(2, K):
            x2 = 2.0 * (laplacian @ x1) - x0
            x_list.append(x2)
            x0, x1 = x1, x2
    xs = jnp.stack(x_list, axis=0).reshape(K, N, F, B)
    xs = jnp.transpose(xs, (3, 1, 2, 0)).reshape(B * N, F * K)
    y = (xs @ weight).reshape(B, N, O)
    y = jax.nn.relu(y + bias.reshape(1, 1, O))
    if pooling_size > 1:
        y = jnp.max(y.reshape(B, N // pooling_size, pooling_size, O), axis=2)
    return y


if __name__ == "__main__":
    # Small shapes consistent with the module:
    #   batch B=2, node_num N=16, in_channels F=32, out_channels O=16,
    #   poly_degree K=3, pooling_size P=2  ->  output (2, 8, 16)
    B, N, F, O, K, P = 2, 16, 32, 16, 3, 2

    key = jax.random.PRNGKey(0)
    kx, ka, kw, kb = jax.random.split(key, 4)

    x = jax.random.normal(kx, (B, N, F), dtype=jnp.float32)

    # Dense normalized-Laplacian stand-in for the (normally sparse) `laplacian`.
    A = jax.nn.relu(jax.random.normal(ka, (N, N), dtype=jnp.float32))
    A = A + A.T
    d = jnp.sum(A, axis=1)
    dinv = jax.lax.rsqrt(d + 1e-10)
    laplacian = jnp.eye(N, dtype=jnp.float32) - (A * dinv[:, None]) * dinv[None, :]

    # truncated_normal_(std=0.1)-style parameters (plain normal*0.1 is fine here)
    weight = 0.1 * jax.random.normal(kw, (K * F, O), dtype=jnp.float32)
    bias = 0.1 * jax.random.normal(kb, (1, 1, O), dtype=jnp.float32)

    ref = poly_gc_reference(x, laplacian, weight, bias, P)

    # Default f32 MXU-input path (exact vs reference).
    out = jax.block_until_ready(poly_gc_forward(x, laplacian, weight, bias, P))
    assert out.shape == (B, N // P, O)
    assert jnp.allclose(out, ref, atol=1e-4, rtol=1e-4), "f32 Pallas kernel mismatch"

    # bf16 MXU-input path (v6e/v7x default at realistic sizes); f32 accumulation
    # and element-wise math, so only loose agreement is expected.
    out_bf16 = jax.block_until_ready(
        poly_gc_forward(x, laplacian, weight, bias, P, matmul_dtype=jnp.bfloat16))
    assert out_bf16.shape == (B, N // P, O)
    assert float(jnp.max(jnp.abs(out_bf16 - ref))) < 0.25, "bf16 Pallas kernel mismatch"

    print("KERNEL_OK")
</pallas_src>

<mosaic_0001>
module attributes {stable_mosaic.version = 11 : i64} {
  func.func @poly_gc_kernel(%arg0: memref<16x64xf32, #tpu.memory_space<vmem>>, %arg1: memref<16x16xf32, #tpu.memory_space<vmem>>, %arg2: memref<3x32x128xf32, #tpu.memory_space<vmem>>, %arg3: memref<1x128xf32, #tpu.memory_space<vmem>>, %arg4: memref<2x8x128xf32, #tpu.memory_space<vmem>>) attributes {dimension_semantics = [], scalar_prefetch = 0 : i64, scratch_operands = 0 : i64, tpu.core_type = #tpu.core_type<tc>} {
    %c0 = arith.constant 0 : index
    %c0_0 = arith.constant 0 : index
    %0 = vector.load %arg1[%c0, %c0_0] : memref<16x16xf32, #tpu.memory_space<vmem>>, vector<16x16xf32>
    %c0_1 = arith.constant 0 : index
    %c0_2 = arith.constant 0 : index
    %1 = vector.load %arg0[%c0_1, %c0_2] : memref<16x64xf32, #tpu.memory_space<vmem>>, vector<16x64xf32>
    %c0_3 = arith.constant 0 : index
    %c0_4 = arith.constant 0 : index
    %2 = vector.load %arg0[%c0_3, %c0_4] : memref<16x64xf32, #tpu.memory_space<vmem>>, vector<16x64xf32>
    %c0_5 = arith.constant 0 : index
    %c0_6 = arith.constant 0 : index
    %c0_7 = arith.constant 0 : index
    %3 = vector.load %arg2[%c0_5, %c0_6, %c0_7] : memref<3x32x128xf32, #tpu.memory_space<vmem>>, vector<1x32x128xf32>
    %4 = vector.shape_cast %3 : vector<1x32x128xf32> to vector<32x128xf32>
    %5 = vector.extract_strided_slice %2 {offsets = [0, 0], sizes = [16, 32], strides = [1, 1]} : vector<16x64xf32> to vector<16x32xf32>
    %cst = arith.constant dense<0.000000e+00> : vector<16x128xf32>
    %6 = tpu.matmul %5, %4, %cst {dimension_numbers = #tpu.dot_dimension_numbers<[1], [0], [0], [1], [0, 0, 1, 1], [], []>} : vector<16x32xf32>, vector<32x128xf32>, vector<16x128xf32> -> vector<16x128xf32>
    %7 = vector.extract_strided_slice %2 {offsets = [0, 32], sizes = [16, 32], strides = [1, 1]} : vector<16x64xf32> to vector<16x32xf32>
    %cst_8 = arith.constant dense<0.000000e+00> : vector<16x128xf32>
    %8 = tpu.matmul %7, %4, %cst_8 {dimension_numbers = #tpu.dot_dimension_numbers<[1], [0], [0], [1], [0, 0, 1, 1], [], []>} : vector<16x32xf32>, vector<32x128xf32>, vector<16x128xf32> -> vector<16x128xf32>
    %cst_9 = arith.constant dense<0.000000e+00> : vector<16x64xf32>
    %9 = tpu.matmul %0, %2, %cst_9 {dimension_numbers = #tpu.dot_dimension_numbers<[1], [0], [0], [1], [0, 0, 1, 1], [], []>} : vector<16x16xf32>, vector<16x64xf32>, vector<16x64xf32> -> vector<16x64xf32>
    %c1 = arith.constant 1 : index
    %c0_10 = arith.constant 0 : index
    %c0_11 = arith.constant 0 : index
    %10 = vector.load %arg2[%c1, %c0_10, %c0_11] : memref<3x32x128xf32, #tpu.memory_space<vmem>>, vector<1x32x128xf32>
    %11 = vector.shape_cast %10 : vector<1x32x128xf32> to vector<32x128xf32>
    %12 = vector.extract_strided_slice %9 {offsets = [0, 0], sizes = [16, 32], strides = [1, 1]} : vector<16x64xf32> to vector<16x32xf32>
    %cst_12 = arith.constant dense<0.000000e+00> : vector<16x128xf32>
    %13 = tpu.matmul %12, %11, %cst_12 {dimension_numbers = #tpu.dot_dimension_numbers<[1], [0], [0], [1], [0, 0, 1, 1], [], []>} : vector<16x32xf32>, vector<32x128xf32>, vector<16x128xf32> -> vector<16x128xf32>
    %14 = arith.addf %6, %13 : vector<16x128xf32>
    %15 = vector.extract_strided_slice %9 {offsets = [0, 32], sizes = [16, 32], strides = [1, 1]} : vector<16x64xf32> to vector<16x32xf32>
    %cst_13 = arith.constant dense<0.000000e+00> : vector<16x128xf32>
    %16 = tpu.matmul %15, %11, %cst_13 {dimension_numbers = #tpu.dot_dimension_numbers<[1], [0], [0], [1], [0, 0, 1, 1], [], []>} : vector<16x32xf32>, vector<32x128xf32>, vector<16x128xf32> -> vector<16x128xf32>
    %17 = arith.addf %8, %16 : vector<16x128xf32>
    %cst_14 = arith.constant dense<0.000000e+00> : vector<16x64xf32>
    %18 = tpu.matmul %0, %9, %cst_14 {dimension_numbers = #tpu.dot_dimension_numbers<[1], [0], [0], [1], [0, 0, 1, 1], [], []>} : vector<16x16xf32>, vector<16x64xf32>, vector<16x64xf32> -> vector<16x64xf32>
    %cst_15 = arith.constant 2.000000e+00 : f32
    %19 = vector.broadcast %cst_15 : f32 to vector<16x64xf32>
    %20 = arith.mulf %19, %18 : vector<16x64xf32>
    %21 = arith.subf %20, %1 : vector<16x64xf32>
    %c2 = arith.constant 2 : index
    %c0_16 = arith.constant 0 : index
    %c0_17 = arith.constant 0 : index
    %22 = vector.load %arg2[%c2, %c0_16, %c0_17] : memref<3x32x128xf32, #tpu.memory_space<vmem>>, vector<1x32x128xf32>
    %23 = vector.shape_cast %22 : vector<1x32x128xf32> to vector<32x128xf32>
    %24 = vector.extract_strided_slice %21 {offsets = [0, 0], sizes = [16, 32], strides = [1, 1]} : vector<16x64xf32> to vector<16x32xf32>
    %cst_18 = arith.constant dense<0.000000e+00> : vector<16x128xf32>
    %25 = tpu.matmul %24, %23, %cst_18 {dimension_numbers = #tpu.dot_dimension_numbers<[1], [0], [0], [1], [0, 0, 1, 1], [], []>} : vector<16x32xf32>, vector<32x128xf32>, vector<16x128xf32> -> vector<16x128xf32>
    %26 = arith.addf %14, %25 : vector<16x128xf32>
    %27 = vector.extract_strided_slice %21 {offsets = [0, 32], sizes = [16, 32], strides = [1, 1]} : vector<16x64xf32> to vector<16x32xf32>
    %cst_19 = arith.constant dense<0.000000e+00> : vector<16x128xf32>
    %28 = tpu.matmul %27, %23, %cst_19 {dimension_numbers = #tpu.dot_dimension_numbers<[1], [0], [0], [1], [0, 0, 1, 1], [], []>} : vector<16x32xf32>, vector<32x128xf32>, vector<16x128xf32> -> vector<16x128xf32>
    %29 = arith.addf %17, %28 : vector<16x128xf32>
    %c0_20 = arith.constant 0 : index
    %c0_21 = arith.constant 0 : index
    %30 = vector.load %arg3[%c0_20, %c0_21] : memref<1x128xf32, #tpu.memory_space<vmem>>, vector<1x128xf32>
    %31 = vector.broadcast %30 : vector<1x128xf32> to vector<16x128xf32>
    %32 = arith.addf %26, %31 : vector<16x128xf32>
    %cst_22 = arith.constant 0.000000e+00 : f32
    %33 = vector.broadcast %cst_22 : f32 to vector<16x128xf32>
    %34 = arith.maximumf %32, %33 : vector<16x128xf32>
    %35 = vector.shape_cast %34 : vector<16x128xf32> to vector<8x2x128xf32>
    %cst_23 = arith.constant dense<0xFF800000> : vector<8x128xf32>
    %36 = vector.multi_reduction <maximumf>, %35, %cst_23 [1] : vector<8x2x128xf32> to vector<8x128xf32>
    %c0_24 = arith.constant 0 : index
    %c0_25 = arith.constant 0 : index
    %c0_26 = arith.constant 0 : index
    %37 = vector.load %arg4[%c0_24, %c0_25, %c0_26] : memref<2x8x128xf32, #tpu.memory_space<vmem>>, vector<1x8x128xf32>
    %38 = vector.shape_cast %37 : vector<1x8x128xf32> to vector<8x128xf32>
    %39 = vector.shape_cast %36 : vector<8x128xf32> to vector<1x8x128xf32>
    tpu.vector_store %arg4[%c0_24, %c0_25, %c0_26], %39 {strides = array<i32>} : memref<2x8x128xf32, #tpu.memory_space<vmem>>, vector<1x8x128xf32>,
    %40 = vector.broadcast %30 : vector<1x128xf32> to vector<16x128xf32>
    %41 = arith.addf %29, %40 : vector<16x128xf32>
    %cst_27 = arith.constant 0.000000e+00 : f32
    %42 = vector.broadcast %cst_27 : f32 to vector<16x128xf32>
    %43 = arith.maximumf %41, %42 : vector<16x128xf32>
    %44 = vector.shape_cast %43 : vector<16x128xf32> to vector<8x2x128xf32>
    %cst_28 = arith.constant dense<0xFF800000> : vector<8x128xf32>
    %45 = vector.multi_reduction <maximumf>, %44, %cst_28 [1] : vector<8x2x128xf32> to vector<8x128xf32>
    %c1_29 = arith.constant 1 : index
    %c0_30 = arith.constant 0 : index
    %c0_31 = arith.constant 0 : index
    %46 = vector.load %arg4[%c1_29, %c0_30, %c0_31] : memref<2x8x128xf32, #tpu.memory_space<vmem>>, vector<1x8x128xf32>
    %47 = vector.shape_cast %46 : vector<1x8x128xf32> to vector<8x128xf32>
    %48 = vector.shape_cast %45 : vector<8x128xf32> to vector<1x8x128xf32>
    tpu.vector_store %arg4[%c1_29, %c0_30, %c0_31], %48 {strides = array<i32>} : memref<2x8x128xf32, #tpu.memory_space<vmem>>, vector<1x8x128xf32>,
    return
  }
}

</mosaic_0001>

<bundles_post_ra>
// kernel: tpu_custom_call.1
= control target key start
LH: loop header
LB: loop body
LE: loop exit
PB: predicated region body
PF: predicated region fallthrough
CT: control target
= control target key end

     0   :  { %9 = vsyncpa [#allocation3], 0  ;;  %s1501_s0 = inlined_call_operand.hbm [shape: f32[16,64], index: 0, kind: input, shape index: {}]   ;;  %s1502_s1 = inlined_call_operand.hbm [shape: f32[16,16], index: 1, kind: input, shape index: {}]   ;;  %s1503_s2 = inlined_call_operand.hbm [shape: f32[3,32,128], index: 2, kind: input, shape index: {}]   ;;  %s1504_s3 = inlined_call_operand.vmem [shape: f32[1,128], index: 3, kind: input, shape index: {}]   ;;  %s1505_s4 = inlined_call_operand.hbm [shape: f32[2,8,128], index: 4, kind: output, shape index: {}]  }
   0x1   :  { %10 = vsyncpa [#allocation6], 0 }
   0x2   :  { %11 = vsyncpa [#allocation4], 0  ;;  %s1318_s15 = smov [#allocation5]   ;;  %s1319_s17 = smov [#allocation2]  }
   0x3   :  { %s29_s16 = sshll.u32 %s1318_s15, 4  ;;  %s17_s18 = sshll.u32 %s1319_s17, 4  ;;  %s30_s16 = int_to_ptr.vmem [resolvable:$true] %s29_s16  ;;  %s1351_s18 = int_to_ptr.vmem [resolvable:$true] %s17_s18 }
   0x4   :  { %s1224_s21 = scalar_lea.hbm %s1502_s1, 256 }
   0x5   :  { %p1225_p0 = scmp.ne.s32.totalorder %s1502_s1, %s1224_s21  ;;  %p1228_p1 = scmp.lt.u32.totalorder %s1224_s21, %s1502_s1 }
   0x7   :  { %p1230_p2 = pnand %p1228_p1, %p1225_p0 }
   0x9   :  { %1233 = shalt.err (!%p1230_p2)
}
   0xa   :  { %s1234_s26 = scalar_lea.vmem %s30_s16, 256  ;;  %p1239_p4 = scmp.lt.s32.totalorder %s30_s16, %s30_s16 }
   0xb   :  { %p1235_p3 = scmp.ne.s32.totalorder %s30_s16, %s1234_s26  ;;  %p1240_p5 = scmp.lt.s32.totalorder %s1234_s26, %s1234_s26 }
   0xd   :  { %p1241_p6 = por %p1240_p5, %p1239_p4 }
   0xf   :  { %p1242_p7 = pnand %p1241_p6, %p1235_p3 }
  0x11   :  { %1245 = shalt.err (!%p1242_p7)
}
  0x12   :  { %s1320_s27 = smov 128   ;;  %s1321_s28 = smov 8  }
  0x13   :  { %35 = dma.hbm_to_vmem [thread:$0]  %s1502_s1, 256, %s30_s16, [#allocation6], %s1320_s27, %s1320_s27, %s1321_s28  }
  0x14   :  { %s1246_s7 = scalar_lea.hbm %s1501_s0, 256 }
  0x15   :  { %p1247_p8 = scmp.ne.s32.totalorder %s1501_s0, %s1246_s7  ;;  %p1250_p9 = scmp.lt.u32.totalorder %s1246_s7, %s1501_s0 }
  0x17   :  { %p1252_p10 = pnand %p1250_p9, %p1247_p8 }
  0x19   :  { %1255 = shalt.err (!%p1252_p10)
}
  0x1a   :  { %s1256_s12 = scalar_lea.vmem %s1351_s18, 256  ;;  %p1261_p12 = scmp.lt.s32.totalorder %s1351_s18, %s1351_s18 }
  0x1b   :  { %p1257_p11 = scmp.ne.s32.totalorder %s1351_s18, %s1256_s12  ;;  %p1262_p13 = scmp.lt.s32.totalorder %s1256_s12, %s1256_s12 }
  0x1d   :  { %p1263_p0 = por %p1262_p13, %p1261_p12 }
  0x1f   :  { %p1264_p1 = pnand %p1263_p0, %p1257_p11 }
  0x21   :  { %1267 = shalt.err (!%p1264_p1)
}
  0x22   :  { %23 = dma.hbm_to_vmem [thread:$0]  %s1501_s0, 256, %s1351_s18, [#allocation3], %s1320_s27, %s1320_s27, %s1321_s28  }
  0x23   :  { %s1322_s14 = smov [#allocation7]   ;;  %s1268_s19 = scalar_lea.hbm %s1503_s2, 1536 }
  0x24   :  { %s41_s15 = sshll.u32 %s1322_s14, 4  ;;  %p1269_p2 = scmp.ne.s32.totalorder %s1503_s2, %s1268_s19  ;;  %s42_s15 = int_to_ptr.vmem [resolvable:$true] %s41_s15 }
  0x25   :  { %p1272_p3 = scmp.lt.u32.totalorder %s1268_s19, %s1503_s2 }
  0x27   :  { %p1274_p4 = pnand %p1272_p3, %p1269_p2 }
  0x29   :  { %1277 = shalt.err (!%p1274_p4)
}
  0x2a   :  { %s1278_s24 = scalar_lea.vmem %s42_s15, 1536  ;;  %p1283_p6 = scmp.lt.s32.totalorder %s42_s15, %s42_s15 }
  0x2b   :  { %p1279_p5 = scmp.ne.s32.totalorder %s42_s15, %s1278_s24  ;;  %p1284_p7 = scmp.lt.s32.totalorder %s1278_s24, %s1278_s24 }
  0x2d   :  { %p1285_p8 = por %p1284_p7, %p1283_p6 }
  0x2f   :  { %p1286_p9 = pnand %p1285_p8, %p1279_p5 }
  0x31   :  { %1289 = shalt.err (!%p1286_p9)
}
  0x32   :  { %47 = dma.hbm_to_vmem [thread:$0]  %s1503_s2, 1536, %s42_s15, [#allocation6], %s1320_s27, %s1320_s27, %s1321_s28  }
  0x33   :  { %1312 = dma.done.wait [#allocation3], 256  }
  0x34   :  { %1313 = vsyncadd [#allocation3], 4294967040 }
  0x35   :  { %1314 = dma.done.wait [#allocation6], 1792  }
  0x36   :  { %1315 = vsyncadd [#allocation6], 4294965504  ;;  %vm67_vm0 = vcmask 130048   ;;  %v1403_v0 = vld [vmem:[#allocation2] sm:$0xff]  ;;  %v1405_v1 = vld [vmem:[#allocation2 + $0x8] sm:$0xff]  ;;  %s1323_s2 = smov 96   ;;  %v752_v40 = vlaneseq }
  0x37   :  { %v59_v2 = vld [vmem:[#allocation5] sm:$0xff]  ;;  %v1152_v3 = vpack.c.bf16 %v1405_v1, %v1403_v0  ;;  %v150_v4 = vld [vmem:[#allocation7 + $0x20] sm:$0xff]  ;;  %v151_v5 = vld [vmem:[#allocation7 + $0x28] sm:$0xff]  ;;  %400 = vrot.lane.b32.xlu1 %v1403_v0, %s1323_s2  ;;  %vm154_vm1 = vcmask 261120   ;;  %v1324_v38 = vmov 1983009808  }
  0x38   :  { %1076 = vmatprep.mubr.msk.f32.mxu0 %vm67_vm0, %v59_v2  ;;  %v1156_v6 = vpack.c.bf16 %v151_v5, %v150_v4  ;;  %v152_v7 = vld [vmem:[#allocation7 + $0x30] sm:$0xff]  ;;  %v153_v8 = vld [vmem:[#allocation7 + $0x38] sm:$0xff]  ;;  %v63_v11 = vld [vmem:[#allocation7] sm:$0xff]  ;;  %v750_v39 = vunpack.c.l.s4 %v1324_v38  ;;  %v753_v42 = vshrl.u32 %v752_v40, 7  ;;  %vm790_vm2 = vcmask 1041408  }
  0x39   :  { %1153 = vmatprep.subr.bf16.mxu0 %v1152_v3  ;;  %v1160_v9 = vpack.c.bf16 %v153_v8, %v152_v7  ;;  %v60_v10 = vld [vmem:[#allocation5 + $0x8] sm:$0xff]  ;;  %v64_v12 = vld [vmem:[#allocation7 + $0x8] sm:$0xff]  ;;  %v65_v14 = vld [vmem:[#allocation7 + $0x10] sm:$0xff]  ;;  %vm855_vm3 = vcmask 1041409   ;;  %vm857_vm4 = vcmask 1042434   ;;  %vm859_vm5 = vcmask 1043459  }
  0x3a   :  { %1155 = vmatpush3.bf16.msra.mxu0 %v1152_v3  ;;  %1157 = vmatprep.subr.bf16.mxu1 %v1156_v6  ;;  %v1164_v13 = vpack.c.bf16 %v64_v12, %v63_v11  ;;  %v66_v15 = vld [vmem:[#allocation7 + $0x18] sm:$0xff]  ;;  %v563_v20 = vld [vmem:[#allocation7 + $0x40] sm:$0xff]  ;;  %v564_v21 = vld [vmem:[#allocation7 + $0x48] sm:$0xff]  ;;  %v751_v41 = vunpack.c.0.s8 %v750_v39  ;;  %vm861_vm6 = vcmask 1044484   ;;  %vm863_vm7 = vcmask 1045509  }
  0x3b   :  { %1159 = vmatpush3.bf16.msra.mxu1 %v1156_v6  ;;  %1173 = vmatprep.subr.bf16.mxu0 %v1156_v6  ;;  %v1168_v18 = vpack.c.bf16 %v66_v15, %v65_v14  ;;  %v1192_v22 = vpack.c.bf16 %v564_v21, %v563_v20  ;;  %v565_v23 = vld [vmem:[#allocation7 + $0x50] sm:$0xff]  ;;  %v566_v24 = vld [vmem:[#allocation7 + $0x58] sm:$0xff]  ;;  %v1440_v43 = vld [vmem:[%s1504_s3] ss:$0 sm:$0xff]  ;;  %vm865_vm8 = vcmask 1046534   ;;  %vm867_vm9 = vcmask 1047559  }
  0x3c   :  { %1161 = vmatprep.subr.bf16.mxu1 %v1160_v9  ;;  %402 = vrot.lane.b32.xlu1 %v1405_v1, %s1323_s2  ;;  %v1196_v25 = vpack.c.bf16 %v566_v24, %v565_v23  ;;  %v1443_v46 = vsub.s32 %v751_v41, %v753_v42  ;;  %s1325_s3 = smov [#allocation8]  }
  0x3d   :  { %1077 = vmatmul.mubr.msk.f32.vlgmr.msra.gmra.mrb[0].mxu0 %vm67_vm0, %v60_v10  ;;  %s998_s29 = sshll.u32 %s1325_s3, 4  ;;  %s999_s29 = int_to_ptr.vmem [resolvable:$true] %s998_s29 }
  0x3e   :  { %1175 = vmatpush3.bf16.msra.mxu0 %v1156_v6  ;;  %s1290_s30 = scalar_lea.vmem %s999_s29, 256  ;;  %p1295_p11 = scmp.lt.s32.totalorder %s999_s29, %s999_s29 }
  0x3f   :  { %1163 = vmatpush3.bf16.msra.mxu1 %v1160_v9  ;;  %1177 = vmatprep.subr.bf16.mxu0 %v1160_v9  ;;  %p1291_p10 = scmp.ne.s32.totalorder %s999_s29, %s1290_s30  ;;  %p1296_p12 = scmp.lt.s32.totalorder %s1290_s30, %s1290_s30 }
  0x40   :  { %1165 = vmatprep.subr.bf16.mxu1 %v1164_v13 }
  0x41   :  { %p1297_p13 = por %p1296_p12, %p1295_p11 }
  0x42   :  { %1179 = vmatpush3.bf16.msra.mxu0 %v1160_v9 }
  0x43   :  { %1181 = vmatprep.subr.bf16.mxu0 %v1164_v13  ;;  %p1298_p0 = pnand %p1297_p13, %p1291_p10 }
  0xa9   :  { %v401_v27 = vpop.permute.xlu1 %400 }
  0xae   :  { %v403_v29 = vpop.permute.xlu1 %402 }
 0x110   :  { %v1078_v16 = vpop.f32.mrb[0].mxu0 }
 0x111   :  { %v140_v17 = vpop.f32.mrb[1].mxu0 }
 0x112   :  { %v1188_v19 = vpack.c.bf16 %v1078_v16, %v140_v17  ;;  %317 = vrot.lane.b32.xlu0 %v140_v17, %s1323_s2  ;;  %1087 = vmatprep.mubr.msk.f32.mxu1 %vm154_vm1, %v140_v17 }
 0x113   :  { %1088 = vmatmul.mubr.msk.f32.vlgmr.msra.gmra.mrb[0].mxu1 %vm154_vm1, %v1078_v16 }
 0x114   :  { %1167 = vmatpush3.bf16.msra.mxu1 %v1164_v13  ;;  %1098 = vmatprep.mubr.msk.f32.mxu1 %vm154_vm1, %v1403_v0 }
 0x115   :  { %1169 = vmatprep.subr.bf16.mxu1 %v1168_v18 }
 0x116   :  { %319 = vrot.lane.b32.xlu0 %v1078_v16, %s1323_s2 }
 0x118   :  { %1171 = vmatpush3.bf16.msra.mxu1 %v1168_v18 }
 0x119   :  { %1189 = vmatprep.subr.bf16.mxu1 %v1188_v19 }
 0x11b   :  { %1099 = vmatmul.mubr.msk.f32.vlgmr.msra.gmra.mrb[0].mxu1 %vm154_vm1, %v1405_v1 }
 0x11c   :  { %1191 = vmatpush3.bf16.msra.mxu1 %v1188_v19  ;;  %1127 = vmatprep.mubr.msk.f32.mxu1 %vm67_vm0, %v59_v2 }
 0x11d   :  { %1193 = vmatprep.subr.bf16.mxu1 %v1192_v22 }
 0x11f   :  { %1128 = vmatmul.mubr.msk.f32.vlgmr.msra.gmra.mrb[2].mxu1 %vm67_vm0, %v60_v10 }
 0x120   :  { %1195 = vmatpush3.bf16.msra.mxu1 %v1192_v22 }
 0x121   :  { %1197 = vmatprep.subr.bf16.mxu1 %v1196_v25 }
 0x124   :  { %1199 = vmatpush3.bf16.msra.mxu1 %v1196_v25 }
 0x184   :  { %v318_v26 = vpop.permute.xlu0 %317 }
 0x185   :  { %1109 = vmatprep.mubr.msk.f32.mxu0 %vm154_vm1, %v318_v26 }
 0x188   :  { %v320_v28 = vpop.permute.xlu0 %319 }
 0x189   :  { %1110 = vmatmul.mubr.msk.f32.vlgmr.msra.gmra.mrb[2].mxu0 %vm154_vm1, %v320_v28 }
 0x18a   :  { %1183 = vmatpush3.bf16.msra.mxu0 %v1164_v13  ;;  %1120 = vmatprep.mubr.msk.f32.mxu0 %vm154_vm1, %v401_v27 }
 0x18b   :  { %1185 = vmatprep.subr.bf16.mxu0 %v1168_v18 }
 0x18e   :  { %1187 = vmatpush3.bf16.msra.mxu0 %v1168_v18 }
 0x18f   :  { %1201 = vmatprep.subr.bf16.mxu0 %v1192_v22 }
 0x191   :  { %1121 = vmatmul.mubr.msk.f32.vlgmr.msra.gmra.mrb[2].mxu0 %vm154_vm1, %v403_v29 }
 0x192   :  { %1203 = vmatpush3.bf16.msra.mxu0 %v1192_v22 }
 0x193   :  { %1205 = vmatprep.subr.bf16.mxu0 %v1196_v25 }
 0x196   :  { %1207 = vmatpush3.bf16.msra.mxu0 %v1196_v25 }
 0x1f2   :  { %v1129_v30 = vpop.f32.mrb[2].mxu1 }
 0x1f3   :  { %v559_v31 = vmul.f32 2.0, %v1129_v30  ;;  %v549_v32 = vpop.f32.mrb[3].mxu1 }
 0x1f4   :  { %v558_v33 = vmul.f32 2.0, %v549_v32 }
 0x1f5   :  { %v561_v34 = vsub.f32 %v559_v31, %v1405_v1 }
 0x1f6   :  { %v560_v35 = vsub.f32 %v558_v33, %v1403_v0 }
 0x1f7   :  { %652 = vrot.lane.b32.xlu1 %v561_v34, %s1323_s2 }
 0x1f8   :  { %650 = vrot.lane.b32.xlu0 %v560_v35, %s1323_s2  ;;  %1138 = vmatprep.mubr.msk.f32.mxu1 %vm154_vm1, %v560_v35 }
 0x1f9   :  { %1139 = vmatmul.mubr.msk.f32.vlgmr.msra.gmra.mrb[0].mxu1 %vm154_vm1, %v561_v34 }
 0x269   :  { %v653_v37 = vpop.permute.xlu1 %652 }
 0x26a   :  { %v651_v36 = vpop.permute.xlu0 %650 }
 0x26b   :  { %1149 = vmatprep.mubr.msk.f32.mxu0 %vm154_vm1, %v651_v36 }
 0x26c   :  { %1150 = vmatmul.mubr.msk.f32.vlgmr.msra.gmra.mrb[2].mxu0 %vm154_vm1, %v653_v37 }
 0x2cc   :  { %v1140_v44 = vpop.f32.mrb[0].mxu1 }
 0x2cd   :  { %v743_v45 = vadd.f32 %v1140_v44, %v1440_v43  ;;  %v639_v47 = vpop.f32.mrb[1].mxu1 }
 0x2ce   :  { %v742_v48 = vadd.f32 %v1440_v43, %v639_v47 }
 0x2cf   :  { %v745_v49 = vmax.f32 %v743_v45, 0.0 }
 0x2d0   :  { %v744_v50 = vmax.f32 %v742_v48, 0.0 }
 0x2d1   :  { %v765_v51 = vcombine.high %v745_v49, %v745_v49  ;;  %v772_v52 = vrot.slane %v745_v49, %v1443_v46 }
 0x2d2   :  { %v748_v53 = vcombine.high %v744_v50, %v744_v50  ;;  %v755_v54 = vrot.slane %v744_v50, %v1443_v46 }
 0x2d3   :  { %v779_v55 = vrot.slane %v765_v51, %v1443_v46  ;;  %v780_v56 = vcombine.high %v772_v52, %v772_v52  ;;  %v819_v57 = vsel %vm790_vm2, %v772_v52, -inf }
 0x2d4   :  { %v820_v58 = vrot.slane %v819_v57, 4  ;;  %v762_v59 = vrot.slane %v748_v53, %v1443_v46  ;;  %v763_v60 = vcombine.high %v755_v54, %v755_v54  ;;  %v791_v61 = vsel %vm790_vm2, %v755_v54, -inf }
 0x2d5   :  { %v781_v62 = vcombine.high %v779_v55, %v779_v55  ;;  %v826_v63 = vsel %vm790_vm2, %v780_v56, -inf  ;;  %v833_v0 = vsel %vm790_vm2, %v779_v55, -inf  ;;  %v792_v1 = vrot.slane %v791_v61, 4 }
 0x2d6   :  { %v821_v2 = vmax.f32 %v819_v57, %v820_v58  ;;  %v827_v3 = vrot.slane %v826_v63, 4  ;;  %v834_v4 = vrot.slane %v833_v0, 4  ;;  %v764_v5 = vcombine.high %v762_v59, %v762_v59 }
 0x2d7   :  { %v840_v6 = vsel %vm790_vm2, %v781_v62, -inf  ;;  %v793_v7 = vmax.f32 %v791_v61, %v792_v1  ;;  %v798_v8 = vsel %vm790_vm2, %v763_v60, -inf  ;;  %v805_v9 = vsel %vm790_vm2, %v762_v59, -inf }
 0x2d8   :  { %v828_v10 = vmax.f32 %v826_v63, %v827_v3  ;;  %v835_v11 = vmax.f32 %v833_v0, %v834_v4  ;;  %v841_v12 = vrot.slane %v840_v6, 4  ;;  %v799_v14 = vrot.slane %v798_v8, 4 }
 0x2d9   :  { %v794_v13 = vrot.slane %v793_v7, 2  ;;  %v806_v15 = vrot.slane %v805_v9, 4  ;;  %v812_v16 = vsel %vm790_vm2, %v764_v5, -inf  ;;  %v822_v17 = vrot.slane %v821_v2, 2 }
 0x2da   :  { %v829_v18 = vrot.slane %v828_v10, 2  ;;  %v842_v19 = vmax.f32 %v840_v6, %v841_v12  ;;  %v800_v21 = vmax.f32 %v798_v8, %v799_v14  ;;  %v813_v23 = vrot.slane %v812_v16, 4 }
 0x2db   :  { %v795_v20 = vmax.f32 %v793_v7, %v794_v13  ;;  %v807_v22 = vmax.f32 %v805_v9, %v806_v15  ;;  %v836_v24 = vrot.slane %v835_v11, 2  ;;  %v823_v29 = vmax.f32 %v821_v2, %v822_v17 }
 0x2dc   :  { %v843_v25 = vrot.slane %v842_v19, 2  ;;  %v801_v26 = vrot.slane %v800_v21, 2  ;;  %v814_v28 = vmax.f32 %v812_v16, %v813_v23  ;;  %v830_v30 = vmax.f32 %v828_v10, %v829_v18 }
 0x2dd   :  { %v808_v27 = vrot.slane %v807_v22, 2  ;;  %v796_v31 = vrot.slane %v795_v20, 1  ;;  %v837_v35 = vmax.f32 %v835_v11, %v836_v24  ;;  %v824_v40 = vrot.slane %v823_v29, 1 }
 0x2de   :  { %v802_v32 = vmax.f32 %v800_v21, %v801_v26  ;;  %v815_v34 = vrot.slane %v814_v28, 2  ;;  %v844_v39 = vmax.f32 %v842_v19, %v843_v25  ;;  %v831_v41 = vrot.slane %v830_v30, 1 }
 0x2df   :  { %v809_v33 = vmax.f32 %v807_v22, %v808_v27  ;;  %v797_v42 = vmax.f32 %v795_v20, %v796_v31  ;;  %v838_v48 = vrot.slane %v837_v35, 1  ;;  %v825_v52 = vmax.f32 %v823_v29, %v824_v40 }
 0x2e0   :  { %v803_v36 = vrot.slane %v802_v32, 1  ;;  %v816_v38 = vmax.f32 %v814_v28, %v815_v34  ;;  %v845_v51 = vrot.slane %v844_v39, 1  ;;  %v832_v54 = vmax.f32 %v830_v30, %v831_v41 }
 0x2e1   :  { %v810_v37 = vrot.slane %v809_v33, 1  ;;  %v839_v56 = vmax.f32 %v837_v35, %v838_v48 }
 0x2e2   :  { %v804_v44 = vmax.f32 %v802_v32, %v803_v36  ;;  %v817_v47 = vrot.slane %v816_v38, 1  ;;  %v846_v58 = vmax.f32 %v844_v39, %v845_v51 }
 0x2e3   :  { %v811_v45 = vmax.f32 %v809_v33, %v810_v37 }
 0x2e4   :  { %v818_v49 = vmax.f32 %v816_v38, %v817_v47  ;;  %v856_v50 = vsel %vm855_vm3, %v804_v44, %v797_v42 }
 0x2e5   :  { %v858_v53 = vsel %vm857_vm4, %v811_v45, %v856_v50 }
 0x2e6   :  { %v860_v55 = vsel %vm859_vm5, %v818_v49, %v858_v53 }
 0x2e7   :  { %v862_v57 = vsel %vm861_vm6, %v825_v52, %v860_v55 }
 0x2e8   :  { %v864_v59 = vsel %vm863_vm7, %v832_v54, %v862_v57 }
 0x2e9   :  { %v866_v60 = vsel %vm865_vm8, %v839_v56, %v864_v59 }
 0x2ea   :  { %v868_v61 = vsel %vm867_vm9, %v846_v58, %v866_v60 }
 0x2eb   :  { %870 = vst [vmem:[#allocation8] sm:$0xff] %v868_v61 }
 0x33f   :  { %v1151_v62 = vpop.f32.mrb[2].mxu0 }
 0x340   :  { %v872_v63 = vadd.f32 %v1151_v62, %v1440_v43  ;;  %v724_v0 = vpop.f32.mrb[3].mxu0 }
 0x341   :  { %v871_v1 = vadd.f32 %v1440_v43, %v724_v0 }
 0x342   :  { %v874_v2 = vmax.f32 %v872_v63, 0.0 }
 0x343   :  { %v873_v3 = vmax.f32 %v871_v1, 0.0 }
 0x344   :  { %v894_v4 = vcombine.high %v874_v2, %v874_v2  ;;  %v901_v5 = vrot.slane %v874_v2, %v1443_v46 }
 0x345   :  { %v877_v6 = vcombine.high %v873_v3, %v873_v3  ;;  %v884_v7 = vrot.slane %v873_v3, %v1443_v46 }
 0x346   :  { %v908_v8 = vrot.slane %v894_v4, %v1443_v46  ;;  %v909_v9 = vcombine.high %v901_v5, %v901_v5  ;;  %v947_v10 = vsel %vm790_vm2, %v901_v5, -inf }
 0x347   :  { %v948_v11 = vrot.slane %v947_v10, 4  ;;  %v891_v12 = vrot.slane %v877_v6, %v1443_v46  ;;  %v892_v13 = vcombine.high %v884_v7, %v884_v7  ;;  %v919_v14 = vsel %vm790_vm2, %v884_v7, -inf }
 0x348   :  { %v910_v43 = vcombine.high %v908_v8, %v908_v8  ;;  %v954_v15 = vsel %vm790_vm2, %v909_v9, -inf  ;;  %v961_v16 = vsel %vm790_vm2, %v908_v8, -inf  ;;  %v920_v17 = vrot.slane %v919_v14, 4 }
 0x349   :  { %v949_v18 = vmax.f32 %v947_v10, %v948_v11  ;;  %v955_v19 = vrot.slane %v954_v15, 4  ;;  %v962_v20 = vrot.slane %v961_v16, 4  ;;  %v893_v21 = vcombine.high %v891_v12, %v891_v12 }
 0x34a   :  { %v968_v22 = vsel %vm790_vm2, %v910_v43, -inf  ;;  %v921_v23 = vmax.f32 %v919_v14, %v920_v17  ;;  %v926_v24 = vsel %vm790_vm2, %v892_v13, -inf  ;;  %v933_v46 = vsel %vm790_vm2, %v891_v12, -inf }
 0x34b   :  { %v956_v25 = vmax.f32 %v954_v15, %v955_v19  ;;  %v963_v26 = vmax.f32 %v961_v16, %v962_v20  ;;  %v969_v27 = vrot.slane %v968_v22, 4  ;;  %v927_v29 = vrot.slane %v926_v24, 4 }
 0x34c   :  { %v922_v28 = vrot.slane %v921_v23, 2  ;;  %v934_v30 = vrot.slane %v933_v46, 4  ;;  %v940_v31 = vsel %vm790_vm2, %v893_v21, -inf  ;;  %v950_v32 = vrot.slane %v949_v18, 2 }
 0x34d   :  { %v957_v33 = vrot.slane %v956_v25, 2  ;;  %v970_v34 = vmax.f32 %v968_v22, %v969_v27  ;;  %v928_v36 = vmax.f32 %v926_v24, %v927_v29  ;;  %v941_v38 = vrot.slane %v940_v31, 4 }
 0x34e   :  { %v923_v35 = vmax.f32 %v921_v23, %v922_v28  ;;  %v935_v37 = vmax.f32 %v933_v46, %v934_v30  ;;  %v964_v39 = vrot.slane %v963_v26, 2  ;;  %v951_v45 = vmax.f32 %v949_v18, %v950_v32 }
 0x34f   :  { %v971_v40 = vrot.slane %v970_v34, 2  ;;  %v929_v41 = vrot.slane %v928_v36, 2  ;;  %v942_v44 = vmax.f32 %v940_v31, %v941_v38  ;;  %v958_v47 = vmax.f32 %v956_v25, %v957_v33 }
 0x350   :  { %v936_v42 = vrot.slane %v935_v37, 2  ;;  %v924_v48 = vrot.slane %v923_v35, 1  ;;  %v965_v52 = vmax.f32 %v963_v26, %v964_v39  ;;  %v952_v57 = vrot.slane %v951_v45, 1 }
 0x351   :  { %v930_v49 = vmax.f32 %v928_v36, %v929_v41  ;;  %v943_v51 = vrot.slane %v942_v44, 2  ;;  %v972_v56 = vmax.f32 %v970_v34, %v971_v40  ;;  %v959_v58 = vrot.slane %v958_v47, 1 }
 0x352   :  { %v937_v50 = vmax.f32 %v935_v37, %v936_v42  ;;  %v925_v59 = vmax.f32 %v923_v35, %v924_v48  ;;  %v966_v63 = vrot.slane %v965_v52, 1  ;;  %v953_v3 = vmax.f32 %v951_v45, %v952_v57 }
 0x353   :  { %v931_v53 = vrot.slane %v930_v49, 1  ;;  %v944_v55 = vmax.f32 %v942_v44, %v943_v51  ;;  %v973_v2 = vrot.slane %v972_v56, 1  ;;  %v960_v5 = vmax.f32 %v958_v47, %v959_v58 }
 0x354   :  { %v938_v54 = vrot.slane %v937_v50, 1  ;;  %v967_v7 = vmax.f32 %v965_v52, %v966_v63 }
 0x355   :  { %v932_v60 = vmax.f32 %v930_v49, %v931_v53  ;;  %v945_v62 = vrot.slane %v944_v55, 1  ;;  %v974_v9 = vmax.f32 %v972_v56, %v973_v2 }
 0x356   :  { %v939_v61 = vmax.f32 %v937_v50, %v938_v54 }
 0x357   :  { %v946_v0 = vmax.f32 %v944_v55, %v945_v62  ;;  %v983_v1 = vsel %vm855_vm3, %v932_v60, %v925_v59 }
 0x358   :  { %v984_v4 = vsel %vm857_vm4, %v939_v61, %v983_v1 }
 0x359   :  { %v985_v6 = vsel %vm859_vm5, %v946_v0, %v984_v4 }
 0x35a   :  { %v986_v8 = vsel %vm861_vm6, %v953_v3, %v985_v6 }
 0x35b   :  { %v987_v10 = vsel %vm863_vm7, %v960_v5, %v986_v8 }
 0x35c   :  { %v988_v11 = vsel %vm865_vm8, %v967_v7, %v987_v10 }
 0x35d   :  { %v989_v12 = vsel %vm867_vm9, %v974_v9, %v988_v11 }
 0x35e   :  { %992 = vst [vmem:[#allocation8 + $0x8] sm:$0xff] %v989_v12 }
 0x35f   :  { %1301 = shalt.err (!%p1298_p0)
}
 0x360   :  { %s1302_s7 = scalar_lea.hbm %s1505_s4, 256 }
 0x361   :  { %p1303_p1 = scmp.ne.s32.totalorder %s1505_s4, %s1302_s7  ;;  %p1306_p2 = scmp.lt.u32.totalorder %s1302_s7, %s1505_s4 }
 0x363   :  { %p1308_p3 = pnand %p1306_p2, %p1303_p1 }
 0x365   :  { %1311 = shalt.err (!%p1308_p3)
}
 0x366   :  { %1004 = dma.vmem_to_hbm [thread:$0]  %s999_s29, 256, %s1505_s4, [#allocation4], %s1320_s27, %s1320_s27, %s1321_s28  }
 0x367   :  { %1316 = dma.done.wait [#allocation4], 256  }
 0x368   :  { %1317 = vsyncadd [#allocation4], 4294967040 }
 0x369   :  { %1008 = vsyncpa [#allocation3], 1 }
 0x36a   :  { %1009 = vsyncpa [#allocation6], 1 }
 0x36b   :  { %1010 = vsyncpa [#allocation4], 1 }

</bundles_post_ra>
